<compile_context>
chip_gen: v6e
topology: v6e:2x2x1
jax: 0.10.0
libtpu: 0.0.40
codegen_flags: <defaults>
</compile_context>

<pallas_src>
import functools

import jax
import jax.numpy as jnp
from jax import lax
from jax.experimental import pallas as pl
from jax.experimental.pallas import tpu as pltpu

_LANES = 128
_ABS_MAX_BLOCK_ROWS = 16384         # 16384 * 128 * 4 B = 8 MiB per f32 block
_EPS = 1e-12
_REDUCTION_MODES = ("none", "mean", "sum")


def _round_up(x, m):
    return ((x + m - 1) // m) * m


def _cdiv(a, b):
    return (a + b - 1) // b


def _nbytes(shape, dtype):
    sz = 1
    for s in shape:
        sz *= int(s)
    return sz * jnp.dtype(dtype).itemsize


def _vmem_limit_bytes():
    """Generation-aware VMEM budget (~3/4 of physical, capped at 96 MiB)."""
    cap = 64 * 1024 * 1024            # safe fallback, valid on v5e/v6e/v7x
    try:
        cap = int(pltpu.get_tpu_info().vmem_capacity_bytes)
    except Exception:
        pass
    return int(min((cap * 3) // 4, 96 * 1024 * 1024))


def _sublane_rows(*dtypes):
    """Minimum row-tile multiple: (8,128) f32, (16,128) bf16, (32,128) int8."""
    isz = min(jnp.dtype(d).itemsize for d in dtypes)
    return max(8, 8 * (4 // max(1, isz)))


def _pick_block_rows(rows, sublane, stream_itemsizes, vmem_limit):
    """Largest row-block fitting the double-buffered VMEM budget, rows split
    evenly across blocks (padding waste bounded by < sublane rows/block)."""
    bytes_per_row = _LANES * sum(int(s) for s in stream_itemsizes)
    budget = vmem_limit // 2                     # headroom for f32 temporaries
    tr_max = budget // (2 * bytes_per_row)       # 2 = double buffering
    tr_max = max(sublane, min(_ABS_MAX_BLOCK_ROWS, (tr_max // sublane) * sublane))
    if rows <= tr_max:
        return rows, 1                           # single block == full rows dim
    n_col = _cdiv(rows, tr_max)
    tr = _round_up(_cdiv(rows, n_col), sublane)
    return tr, _cdiv(rows, tr)


# ----------------------------- kernels ------------------------------------ #

def _sums_kernel(rows, tr, needs_mask, p_ref, t_ref, l_ref):
    # Blocks are (1, 1, tr, 128); reduce over sublanes only, keep 128 lane
    # partials (no cross-lane XLU reduce inside the kernel).
    d = p_ref[...].astype(jnp.float32) - t_ref[...].astype(jnp.float32)
    val = d * d
    if needs_mask:  # ragged final row-block: OOB reads are garbage -> mask
        ridx = pl.program_id(1) * tr + lax.broadcasted_iota(jnp.int32, val.shape, 2)
        val = jnp.where(ridx < rows, val, 0.0)
    l_ref[...] = jnp.sum(val, axis=(0, 1, 2)).reshape(l_ref.shape)


def _sums_weighted_kernel(rows, tr, needs_mask, p_ref, t_ref, w_ref, l_ref, s_ref):
    p = p_ref[...].astype(jnp.float32)
    t = t_ref[...].astype(jnp.float32)
    w = w_ref[...].astype(jnp.float32)
    d = p - t
    lval = d * d * w
    wval = w
    if needs_mask:
        ridx = pl.program_id(1) * tr + lax.broadcasted_iota(jnp.int32, lval.shape, 2)
        valid = ridx < rows
        lval = jnp.where(valid, lval, 0.0)
        wval = jnp.where(valid, wval, 0.0)
    l_ref[...] = jnp.sum(lval, axis=(0, 1, 2)).reshape(l_ref.shape)

    # The weight block is shared across the innermost channel-group axis;
    # write its partial sum only once and scale by g in the epilogue.
    @pl.when(pl.program_id(2) == 0)
    def _():
        s_ref[...] = jnp.sum(wval, axis=(0, 1, 2)).reshape(s_ref.shape)


def _elem_kernel(loss_weight, p_ref, t_ref, o_ref):
    d = p_ref[...].astype(jnp.float32) - t_ref[...].astype(jnp.float32)
    val = d * d
    if loss_weight != 1.0:          # compile-time constant
        val = loss_weight * val
    o_ref[...] = val.astype(o_ref.dtype)


def _elem_weighted_kernel(loss_weight, p_ref, t_ref, w_ref, o_ref):
    d = p_ref[...].astype(jnp.float32) - t_ref[...].astype(jnp.float32)
    val = d * d * w_ref[...].astype(jnp.float32)
    if loss_weight != 1.0:
        val = loss_weight * val
    o_ref[...] = val.astype(o_ref.dtype)


# --------------------------- pallas wrappers ------------------------------- #

def _compiler_params(vmem_limit, last_axis):
    return pltpu.CompilerParams(
        dimension_semantics=("parallel", "parallel", last_axis),
        vmem_limit_bytes=vmem_limit)


def _pallas_sums(pred4, target4, weight4, rows, tr, n_col, vmem_limit):
    """Per-sample sum((pred-target)^2 [* w]) and (broadcast) sum(w)."""
    n, g = pred4.shape[0], pred4.shape[1]
    grid = (n, n_col, g)            # g innermost: shared-weight block reused
    needs_mask = (rows % tr) != 0
    in_blk = pl.BlockSpec((1, 1, tr, _LANES), lambda i, j, c: (i, c, j, 0))
    lsum_blk = pl.BlockSpec((1, 1, 1, 1, _LANES), lambda i, j, c: (i, c, j, 0, 0))
    lsum_sd = jax.ShapeDtypeStruct((n, g, n_col, 1, _LANES), jnp.float32)
    elems = n * g * rows * _LANES

    if weight4 is None:
        cost = pl.CostEstimate(
            flops=3 * elems, transcendentals=0,
            bytes_accessed=_nbytes(pred4.shape, pred4.dtype)
            + _nbytes(target4.shape, target4.dtype)
            + _nbytes(lsum_sd.shape, lsum_sd.dtype))
        lsum = pl.pallas_call(
            functools.partial(_sums_kernel, rows, tr, needs_mask),
            out_shape=lsum_sd,
            grid_spec=pltpu.PrefetchScalarGridSpec(
                num_scalar_prefetch=0, grid=grid,
                in_specs=[in_blk, in_blk], out_specs=lsum_blk),
            compiler_params=_compiler_params(vmem_limit, "arbitrary"),
            cost_estimate=cost,
        )(pred4, target4)
        return lsum.sum(axis=(1, 2, 3, 4)), None

    w_blk = pl.BlockSpec((1, 1, tr, _LANES), lambda i, j, c: (i, 0, j, 0))
    wsum_blk = pl.BlockSpec((1, 1, 1, _LANES), lambda i, j, c: (i, j, 0, 0))
    wsum_sd = jax.ShapeDtypeStruct((n, n_col, 1, _LANES), jnp.float32)
    cost = pl.CostEstimate(
        flops=5 * elems, transcendentals=0,
        bytes_accessed=_nbytes(pred4.shape, pred4.dtype)
        + _nbytes(target4.shape, target4.dtype)
        + _nbytes(weight4.shape, weight4.dtype)
        + _nbytes(lsum_sd.shape, lsum_sd.dtype)
        + _nbytes(wsum_sd.shape, wsum_sd.dtype))
    lsum, wsum = pl.pallas_call(
        functools.partial(_sums_weighted_kernel, rows, tr, needs_mask),
        out_shape=(lsum_sd, wsum_sd),
        grid_spec=pltpu.PrefetchScalarGridSpec(
            num_scalar_prefetch=0, grid=grid,
            in_specs=[in_blk, in_blk, w_blk],
            out_specs=[lsum_blk, wsum_blk]),
        compiler_params=_compiler_params(vmem_limit, "arbitrary"),
        cost_estimate=cost,
    )(pred4, target4, weight4)
    # wsum ignores the channel-group axis; scale by g = broadcast factor.
    return lsum.sum(axis=(1, 2, 3, 4)), wsum.sum(axis=(1, 2, 3)) * g


def _pallas_elementwise(pred4, target4, weight4, rows, tr, n_col, loss_weight,
                        out_dtype, vmem_limit):
    """Elementwise loss_weight * (pred-target)^2 [* w] for reduction='none'."""
    n, g = pred4.shape[0], pred4.shape[1]
    grid = (n, n_col, g)
    io_blk = pl.BlockSpec((1, 1, tr, _LANES), lambda i, j, c: (i, c, j, 0))
    # Output is exactly rows*128 per slab (no row padding); OOB writes of a
    # ragged final block are discarded by Pallas.
    out_sd = jax.ShapeDtypeStruct((n, g, rows, _LANES), out_dtype)
    elems = n * g * rows * _LANES

    if weight4 is None:
        kern = functools.partial(_elem_kernel, loss_weight)
        in_specs = [io_blk, io_blk]
        args = (pred4, target4)
        flops = 3 * elems
        in_bytes = (_nbytes(pred4.shape, pred4.dtype)
                    + _nbytes(target4.shape, target4.dtype))
    else:
        kern = functools.partial(_elem_weighted_kernel, loss_weight)
        w_blk = pl.BlockSpec((1, 1, tr, _LANES), lambda i, j, c: (i, 0, j, 0))
        in_specs = [io_blk, io_blk, w_blk]
        args = (pred4, target4, weight4)
        flops = 4 * elems
        in_bytes = (_nbytes(pred4.shape, pred4.dtype)
                    + _nbytes(target4.shape, target4.dtype)
                    + _nbytes(weight4.shape, weight4.dtype))

    cost = pl.CostEstimate(flops=flops, transcendentals=0,
                           bytes_accessed=in_bytes + _nbytes(out_sd.shape, out_dtype))
    return pl.pallas_call(
        kern,
        out_shape=out_sd,
        grid_spec=pltpu.PrefetchScalarGridSpec(
            num_scalar_prefetch=0, grid=grid,
            in_specs=in_specs, out_specs=io_blk),
        compiler_params=_compiler_params(vmem_limit, "parallel"),
        cost_estimate=cost,
    )(*args)


# ------------------------------- module ------------------------------------ #

class MSELoss:
    """JAX/Pallas port of mmedit.models.losses.pixelwise_loss.MSELoss."""

    def __init__(self, loss_weight=1.0, reduction="mean", sample_wise=False):
        if reduction not in _REDUCTION_MODES:
            raise ValueError(f"Unsupported reduction mode: {reduction}. "
                             f"Supported ones are: {list(_REDUCTION_MODES)}")
        self.loss_weight = float(loss_weight)
        self.reduction = reduction
        self.sample_wise = sample_wise

    def __call__(self, pred, target, weight=None):
        pred = jnp.asarray(pred)
        target = jnp.asarray(target)
        n, c, h, w = pred.shape
        has_weight = weight is not None
        if has_weight:
            weight = jnp.asarray(weight)

        # Choose layout. G (= channel-group axis) > 1 only when the weight is
        # a per-pixel (N,1,H,W) mask shared across channels.
        if has_weight and weight.shape != pred.shape:
            if weight.shape == (n, 1, h, w):
                g, m = c, h * w
                pred3 = pred.reshape(n, c, m)
                target3 = target.reshape(n, c, m)
                weight3 = weight.reshape(n, 1, m)
            else:
                # TODO(synk): uncommon broadcast patterns fall back to
                # materializing the broadcast weight (correct, extra traffic).
                g, m = 1, c * h * w
                pred3 = pred.reshape(n, 1, m)
                target3 = target.reshape(n, 1, m)
                weight3 = jnp.broadcast_to(weight, pred.shape).reshape(n, 1, m)
        else:
            g, m = 1, c * h * w
            pred3 = pred.reshape(n, 1, m)
            target3 = target.reshape(n, 1, m)
            weight3 = weight.reshape(n, 1, m) if has_weight else None

        # Lane-dense slab: (n, g, rows, 128).  No padding pass when m is a
        # 128 multiple (the common case); otherwise a minimal lane-tail pad.
        m_128 = _round_up(m, _LANES)
        rows = m_128 // _LANES

        def to4(x3):
            if x3 is None:
                return None
            if m_128 != m:
                # TODO(synk): non-128-multiple inner size costs one extra pad
                # copy; typical image shapes take the zero-copy reshape path.
                x3 = jnp.pad(x3, ((0, 0), (0, 0), (0, m_128 - m)))
            return x3.reshape(x3.shape[0], x3.shape[1], rows, _LANES)

        pred4 = to4(pred3)
        target4 = to4(target3)
        weight4 = to4(weight3)

        # Generation-aware VMEM budget, dtype-aware sublane rounding, and
        # stream-count-aware block sizing.
        vmem_limit = _vmem_limit_bytes()
        dtypes = [pred.dtype, target.dtype]
        if has_weight:
            dtypes.append(weight.dtype)
        sublane = _sublane_rows(*dtypes)
        stream_itemsizes = [jnp.dtype(d).itemsize for d in dtypes]
        if self.reduction == "none":
            stream_itemsizes.append(jnp.dtype(pred.dtype).itemsize)   # output
        tr, n_col = _pick_block_rows(rows, sublane, stream_itemsizes, vmem_limit)

        if self.reduction == "none":
            out4 = _pallas_elementwise(pred4, target4, weight4, rows, tr, n_col,
                                       self.loss_weight, pred.dtype, vmem_limit)
            out = out4.reshape(n, g, m_128)
            if m_128 != m:
                out = out[:, :, :m]
            return out.reshape(n, c, h, w)

        # Ragged row tails are masked in-kernel; lane-tail padding (if any)
        # is zeros, so both sums are exact.
        lsum, wsum = _pallas_sums(pred4, target4, weight4, rows, tr, n_col,
                                  vmem_limit)

        if self.reduction == "sum":
            loss = jnp.sum(lsum)
        else:  # 'mean'
            if not has_weight:
                loss = jnp.sum(lsum) / (n * c * h * w)
            elif self.sample_wise:
                loss = jnp.sum(lsum / (wsum + _EPS)) / n
            else:
                loss = jnp.sum(lsum) / (jnp.sum(wsum) + _EPS)
        return self.loss_weight * loss


# -------------------------------- demo -------------------------------------- #

if __name__ == "__main__":
    key = jax.random.PRNGKey(0)
    k1, k2, k3 = jax.random.split(key, 3)
    N, C, H, W = 2, 4, 16, 16
    pred = jax.random.normal(k1, (N, C, H, W), dtype=jnp.float32)
    target = jax.random.normal(k2, (N, C, H, W), dtype=jnp.float32)
    weight = (jax.random.uniform(k3, (N, 1, H, W)) > 0.5).astype(jnp.float32)
    wfull = jnp.broadcast_to(weight, pred.shape)

    # default: reduction='mean', no weight (unweighted fast path)
    loss_mod = MSELoss(loss_weight=1.0, reduction="mean", sample_wise=False)
    out = jax.block_until_ready(loss_mod(pred, target))
    ref = jnp.mean((pred - target) ** 2)
    assert jnp.allclose(out, ref, atol=1e-5), (out, ref)

    # weighted mean (pixel-wise), per-pixel (N,1,H,W) mask path
    out_w = jax.block_until_ready(loss_mod(pred, target, weight))
    ref_w = jnp.sum((pred - target) ** 2 * wfull) / (jnp.sum(wfull) + _EPS)
    assert jnp.allclose(out_w, ref_w, atol=1e-5), (out_w, ref_w)

    # weighted mean (sample-wise)
    loss_sw = MSELoss(reduction="mean", sample_wise=True)
    out_sw = jax.block_until_ready(loss_sw(pred, target, weight))
    ls = jnp.sum((pred - target) ** 2 * wfull, axis=(1, 2, 3))
    ws = jnp.sum(wfull, axis=(1, 2, 3))
    ref_sw = jnp.sum(ls / (ws + _EPS)) / N
    assert jnp.allclose(out_sw, ref_sw, atol=1e-5), (out_sw, ref_sw)

    # full-shape weight path
    out_f = jax.block_until_ready(loss_mod(pred, target, wfull))
    assert jnp.allclose(out_f, ref_w, atol=1e-5), (out_f, ref_w)

    # reduction='none' (unweighted and per-pixel weighted)
    loss_none = MSELoss(reduction="none")
    out_n = jax.block_until_ready(loss_none(pred, target))
    assert out_n.shape == pred.shape
    assert jnp.allclose(out_n, (pred - target) ** 2, atol=1e-6)
    out_nw = jax.block_until_ready(loss_none(pred, target, weight))
    assert jnp.allclose(out_nw, (pred - target) ** 2 * wfull, atol=1e-6)

    # reduction='sum' with loss_weight
    loss_sum = MSELoss(loss_weight=0.5, reduction="sum")
    out_s = jax.block_until_ready(loss_sum(pred, target, weight))
    ref_s = 0.5 * jnp.sum((pred - target) ** 2 * wfull)
    assert jnp.allclose(out_s, ref_s, atol=1e-4), (out_s, ref_s)

    # bf16 inputs (dtype-aware sublane path), unweighted mean
    pred_b = pred.astype(jnp.bfloat16)
    target_b = target.astype(jnp.bfloat16)
    out_b = jax.block_until_ready(loss_mod(pred_b, target_b))
    ref_b = jnp.mean((pred_b.astype(jnp.float32) - target_b.astype(jnp.float32)) ** 2)
    assert jnp.allclose(out_b, ref_b, atol=1e-4), (out_b, ref_b)

    print("KERNEL_OK")
</pallas_src>

<mosaic_0001>
module attributes {stable_mosaic.version = 11 : i64} {
  func.func @_sums_kernel(%arg0: i32, %arg1: i32, %arg2: i32, %arg3: memref<1x1x8x128xf32, #tpu.memory_space<vmem>>, %arg4: memref<1x1x8x128xf32, #tpu.memory_space<vmem>>, %arg5: memref<1x1x1x1x128xf32, #tpu.memory_space<vmem>>) attributes {dimension_semantics = [#tpu.dimension_semantics<parallel>, #tpu.dimension_semantics<parallel>, #tpu.dimension_semantics<arbitrary>], iteration_bounds = array<i64: 2, 1, 1>, scalar_prefetch = 0 : i64, scratch_operands = 0 : i64, tpu.core_type = #tpu.core_type<tc>, window_params = [{transform_indices = @transform_0, window_bounds = array<i64: 1, 1, 8, 128>}, {transform_indices = @transform_1, window_bounds = array<i64: 1, 1, 8, 128>}, {transform_indices = @transform_2, window_bounds = array<i64: 1, 1, 1, 1, 128>}]} {
    %c0 = arith.constant 0 : index
    %c0_0 = arith.constant 0 : index
    %c0_1 = arith.constant 0 : index
    %c0_2 = arith.constant 0 : index
    %0 = vector.load %arg3[%c0, %c0_0, %c0_1, %c0_2] : memref<1x1x8x128xf32, #tpu.memory_space<vmem>>, vector<1x1x8x128xf32>
    %c0_3 = arith.constant 0 : index
    %c0_4 = arith.constant 0 : index
    %c0_5 = arith.constant 0 : index
    %c0_6 = arith.constant 0 : index
    %1 = vector.load %arg4[%c0_3, %c0_4, %c0_5, %c0_6] : memref<1x1x8x128xf32, #tpu.memory_space<vmem>>, vector<1x1x8x128xf32>
    %2 = arith.subf %0, %1 : vector<1x1x8x128xf32>
    %3 = arith.mulf %2, %2 : vector<1x1x8x128xf32>
    %cst = arith.constant dense<0.000000e+00> : vector<128xf32>
    %4 = vector.multi_reduction <add>, %3, %cst [0, 1, 2] : vector<1x1x8x128xf32> to vector<128xf32>
    %5 = vector.shape_cast %4 : vector<128xf32> to vector<1x1x1x1x128xf32>
    %c0_7 = arith.constant 0 : index
    %c0_8 = arith.constant 0 : index
    %c0_9 = arith.constant 0 : index
    %c0_10 = arith.constant 0 : index
    %c0_11 = arith.constant 0 : index
    %6 = vector.load %arg5[%c0_7, %c0_8, %c0_9, %c0_10, %c0_11] : memref<1x1x1x1x128xf32, #tpu.memory_space<vmem>>, vector<1x1x1x1x128xf32>
    tpu.vector_store %arg5[%c0_7, %c0_8, %c0_9, %c0_10, %c0_11], %5 {strides = array<i32>} : memref<1x1x1x1x128xf32, #tpu.memory_space<vmem>>, vector<1x1x1x1x128xf32>,
    return
  }
  func.func @transform_0(%arg0: i32, %arg1: i32, %arg2: i32) -> (i32, i32, i32, i32) {
    %c0_i32 = arith.constant 0 : i32
    %c0_i32_0 = arith.constant 0 : i32
    return %arg0, %arg2, %arg1, %c0_i32 : i32, i32, i32, i32
  }
  func.func @transform_1(%arg0: i32, %arg1: i32, %arg2: i32) -> (i32, i32, i32, i32) {
    %c0_i32 = arith.constant 0 : i32
    %c0_i32_0 = arith.constant 0 : i32
    return %arg0, %arg2, %arg1, %c0_i32 : i32, i32, i32, i32
  }
  func.func @transform_2(%arg0: i32, %arg1: i32, %arg2: i32) -> (i32, i32, i32, i32, i32) {
    %c0_i32 = arith.constant 0 : i32
    %c0_i32_0 = arith.constant 0 : i32
    %c0_i32_1 = arith.constant 0 : i32
    return %arg0, %arg2, %arg1, %c0_i32, %c0_i32_0 : i32, i32, i32, i32, i32
  }
}

</mosaic_0001>

<bundles_post_ra>
// kernel: tpu_custom_call.1
= control target key start
LH: loop header
LB: loop body
LE: loop exit
PB: predicated region body
PF: predicated region fallthrough
CT: control target
= control target key end

     0   :  { %7 = vsyncpa [#allocation3], 0  ;;  %s765_s0 = inlined_call_operand.hbm [shape: f32[2,1,8,128], index: 0, kind: input, shape index: {}]   ;;  %s766_s1 = inlined_call_operand.hbm [shape: f32[2,1,8,128], index: 1, kind: input, shape index: {}]   ;;  %s767_s2 = inlined_call_operand.hbm [shape: f32[2,1,1,1,128], index: 2, kind: output, shape index: {}]  }
   0x1   :  { %9 = vsyncpa [#allocation3 + $0x1], 0 }
   0x2   :  { %10 = vsyncpa [#allocation6], 0 }
   0x3   :  { %12 = vsyncpa [#allocation6 + $0x1], 0 }
   0x4   :  { %13 = vsyncpa [#allocation4], 0 }
   0x5   :  { %15 = vsyncpa [#allocation4 + $0x1], 0  ;;  %s603_s9 = smov 0   ;;  %s605_s10 = smov 0  }
   0x6   :  { %s607_s11 = smov 0   ;;  %s609_s12 = smov 0  }
   0x7   :  { %s611_s13 = smov 0   ;;  %s613_s14 = smov 0  }
   0x8 LB: > { %s362_s15 = sadd.s32 4294967295, %s583_s14   ;;  %s363_s16 = sadd.s32 4294967294, %s583_s14   ;;  %s583_s14 = sphi %s613_s14, %s21_s14   ;;  %s579_s13 = sphi %s611_s13, %s779_s13   ;;  %s575_s12 = sphi %s609_s12, %s778_s12   ;;  %s571_s11 = sphi %s607_s11, %s777_s11   ;;  %s567_s10 = sphi %s605_s10, %s776_s10   ;;  %s563_s9 = sphi %s603_s9, %s775_s9  }
   0x9   : > { %s40_s17 = sadd.s32 1, %s579_s13  ;;  %s51_s18 = sadd.s32 1, %s571_s11 }
   0xa   : > { %p42_p0 = scmp.ge.s32.totalorder %s40_s17, 2  ;;  %p58_p1 = scmp.ne.s32.totalorder %s571_s11, %s567_s10 }
   0xb   : > { %p59_p2 = scmp.eq.s32.totalorder %s583_s14, 0  ;;  %p64_p3 = scmp.ne.s32.totalorder %s567_s10, %s563_s9 }
   0xc   : > { %s781_s17 = smov (%p42_p0, %s40_s17), 0  ;;  %p65_p5 = scmp.eq.s32.totalorder %s362_s15, 0 }
   0xd   : > { %p644_p4 = por %p59_p2, %p58_p1  ;;  %s44_s20 = ssub.s32 %s579_s13, %s781_s17 }
   0xe   : > { %p122_p6 = scmp.eq.s32.totalorder %s362_s15, 1  ;;  %p49_p7 = scmp.eq.s32.totalorder %s44_s20, 0 }
   0xf   : > { %p650_p8 = por %p65_p5, %p64_p3  ;;  %p128_p10 = scmp.eq.s32.totalorder %s363_s16, 1 }
  0x10   : > { %p654_p9 = por %p122_p6, %p58_p1  ;;  %p393_p13 = scmp.lt.s32.totalorder %s583_s14, 2 }
  0x11   : > { %s659_s23 = scalar_select %p49_p7, %s571_s11, %s51_s18  }
  0x12   : > { %p661_p11 = por %p128_p10, %p64_p3  ;;  %s668_s25 = sand.u32 1, %s571_s11  }
  0x13   : > { %s366_s26 = sshll.u32 %s668_s25, 3  ;;  %s367_s27 = sshll.u32 %s579_s13, 7 }
  0x14   : > { %s159_s30 = scalar_lea.hbm %s765_s0, %s367_s27  ;;  %s152_s3 = scalar_lea.vmem [#allocation2], %s366_s26 }
  0x15   : > { %s161_s4 = sshll.u32 %s152_s3, 4  ;;  %p677_p0 = pnand %p393_p13, %p644_p4  ;;  %s162_s4 = int_to_ptr.vmem [resolvable:$true] %s161_s4 }
  0x16   : > { %p370_p1 = scmp.ge.s32.totalorder %s583_s14, 1  ;;  %p186_p2 = scmp.lt.s32.totalorder %s583_s14, 3 }
  0x17   : > { %s149_s6 = scalar_lea.sflag [#allocation3], %s668_s25  ;;  %p445_p3 = pneg %p677_p0 }
  0x18   : > { %s456_s7 = scalar_lea.vmem %s162_s4, 128  ;;  %s585_s8 = smov [#allocation2]  }
  0x19   : > { %p457_p5 = scmp.ne.s32.totalorder %s162_s4, %s456_s7  ;;  %s461_s15 = sshll.u32 %s585_s8, 4  ;;  %s462_s15 = int_to_ptr.vmem [resolvable:$false] %s461_s15 }
  0x1a   : > { %s463_s16 = scalar_lea.vmem %s462_s15, 256  ;;  %p464_p4 = scmp.lt.s32.totalorder %s162_s4, %s462_s15 }
  0x1b   : > { %p459_p6 = pnand %p457_p5, %p445_p3  ;;  %p465_p10 = scmp.lt.s32.totalorder %s463_s16, %s456_s7 }
  0x1d   : > { %p460_p7 = pneg %p459_p6  ;;  %p466_p13 = por %p465_p10, %p464_p4 }
  0x1f   : > { %p467_p12 = pnand %p466_p13, %p460_p7 }
  0x21   : > { %470 = shalt.err (!%p467_p12)
}
  0x22   : > { %385 = dma.hbm_to_vmem [thread:$0]  (!%p677_p0), %s159_s30, 128, %s162_s4, %s149_s6  }
  0x23   : > { %p695_p5 = pnand %p370_p1, %p186_p2  ;;  %s179_s28 = scalar_lea.hbm %s766_s1, %s367_s27 }
  0x24   : > { %s172_s29 = scalar_lea.vmem [#allocation5], %s366_s26  ;;  %s169_s7 = scalar_lea.sflag [#allocation6], %s668_s25 }
  0x25   : > { %s181_s3 = sshll.u32 %s172_s29, 4  ;;  %s586_s30 = smov [#allocation5]   ;;  %s182_s3 = int_to_ptr.vmem [resolvable:$true] %s181_s3 }
  0x26   : > { %s484_s8 = scalar_lea.vmem %s182_s3, 128  ;;  %s489_s4 = sshll.u32 %s586_s30, 4  ;;  %s490_s4 = int_to_ptr.vmem [resolvable:$false] %s489_s4 }
  0x27   : > { %p485_p12 = scmp.ne.s32.totalorder %s182_s3, %s484_s8  ;;  %s491_s6 = scalar_lea.vmem %s490_s4, 256 }
  0x28   : > { %p492_p1 = scmp.lt.s32.totalorder %s182_s3, %s490_s4  ;;  %p493_p2 = scmp.lt.s32.totalorder %s491_s6, %s484_s8 }
  0x29   : > { %p487_p6 = pnand %p485_p12, %p445_p3 }
  0x2a   : > { %p494_p4 = por %p493_p2, %p492_p1 }
  0x2b   : > { %p488_p7 = pneg %p487_p6 }
  0x2d   : > { %p495_p10 = pnand %p494_p4, %p488_p7 }
  0x2f   : > { %498 = shalt.err (!%p495_p10)
}
  0x30   : > { %388 = dma.hbm_to_vmem [thread:$0]  (!%p677_p0), %s179_s28, 128, %s182_s3, %s169_s7  }
  0x31   : > { %190 = sbr.rel (%p695_p5) target bundleno = 87 (0x57), region = 28  ;;  %s711_s25 = sand.u32 (!%p695_p5), 1, %s567_s10  }
  0x32   : > { %s371_s26 = sshll.u32 (!%p695_p5), %s711_s25, 3  ;;  %s193_s27 = scalar_lea.sflag (!%p695_p5), [#allocation3], %s711_s25 }
  0x33   : > { %s196_s15 = scalar_lea.vmem (!%p695_p5), [#allocation2], %s371_s26 }
  0x36   : > { %550 = dma.done.wait (%p650_p8), %s193_s27, 128  }
  0x37   : > { %552 = vsyncadd (%p650_p8), %s193_s27, 4294967168  ;;  %s202_s5 = scalar_lea.sflag [#allocation6], %s711_s25  ;;  %s205_s16 = scalar_lea.vmem [#allocation5], %s371_s26 }
  0x38   : > { %554 = dma.done.wait (%p650_p8), %s202_s5, 128  }
  0x39   : > { %556 = vsyncadd (%p650_p8), %s202_s5, 4294967168  ;;  %v230_v0 = vld [vmem:[%s196_s15] sm:$0xff]  ;;  %v231_v1 = vld [vmem:[%s205_s16] sm:$0xff]  ;;  %s229_s18 = scalar_lea.vmem [#allocation7], %s711_s25  ;;  %s373_s20 = sshll.u32 %s575_s12, 4 }
  0x3a   : > { %v232_v2 = vsub.f32 %v230_v0, %v231_v1  ;;  %s256_s19 = sshll.u32 %s229_s18, 4  ;;  %s254_s29 = scalar_lea.hbm %s767_s2, %s373_s20  ;;  %s257_s19 = int_to_ptr.vmem [resolvable:$true] %s256_s19 }
  0x3b   : > { %s242_s3 = scalar_lea.sflag [#allocation4], %s711_s25  ;;  %s499_s7 = scalar_lea.vmem %s257_s19, 16 }
  0x3c   : > { %v233_v3 = vmul.f32 %v232_v2, %v232_v2  ;;  %p500_p8 = scmp.ne.s32.totalorder %s257_s19, %s499_s7  ;;  %s587_s8 = smov [#allocation7]  }
  0x3d   : > { %s503_s30 = sshll.u32 %s587_s8, 4  ;;  %s504_s30 = int_to_ptr.vmem [resolvable:$false] %s503_s30 }
  0x3e   : > { %v234_v4 = vrot.slane %v233_v3, 4  ;;  %p501_p0 = pnand %p500_p8, %p654_p9  ;;  %s505_s4 = scalar_lea.vmem %s504_s30, 32 }
  0x3f   : > { %p506_p13 = scmp.lt.s32.totalorder %s257_s19, %s504_s30  ;;  %p507_p5 = scmp.lt.s32.totalorder %s505_s4, %s499_s7 }
  0x40   : > { %v235_v5 = vadd.f32 %v234_v4, %v233_v3  ;;  %p502_p3 = pneg %p501_p0 }
  0x41   : > { %p508_p12 = por %p507_p5, %p506_p13 }
  0x42   : > { %v236_v6 = vrot.slane %v235_v5, 2 }
  0x43   : > { %p509_p6 = pnand %p508_p12, %p502_p3 }
  0x44   : > { %v237_v7 = vadd.f32 %v236_v6, %v235_v5 }
  0x46   : > { %v238_v8 = vrot.slane %v237_v7, 1 }
  0x48   : > { %v239_v9 = vadd.f32 %v238_v8, %v237_v7 }
  0x4a   : > { %240 = vst [vmem:[%s229_s18] sm:$0x1] %v239_v9 }
  0x4b   : > { %512 = shalt.err (!%p509_p6)
}
  0x4c   : > { %s513_s12 = scalar_lea.hbm %s254_s29, 16  ;;  %s517_s26 = scalar_lea.hbm %s767_s2, 32 }
  0x4d   : > { %p514_p7 = scmp.ne.s32.totalorder %s254_s29, %s513_s12  ;;  %p518_p4 = scmp.lt.s32.totalorder %s254_s29, %s767_s2 }
  0x4e   : > { %p519_p10 = scmp.lt.s32.totalorder %s517_s26, %s513_s12 }
  0x4f   : > { %p515_p1 = pnand %p514_p7, %p654_p9 }
  0x50   : > { %p520_p8 = por %p519_p10, %p518_p4 }
  0x51   : > { %p516_p2 = pneg %p515_p1 }
  0x53   : > { %p521_p0 = pnand %p520_p8, %p516_p2 }
  0x55   : > { %524 = shalt.err (!%p521_p0)
}
  0x56   : > { %380 = dma.vmem_to_hbm [thread:$0]  (%p654_p9), %s257_s19, 16, %s254_s29, %s242_s3  }
  0x57 PF: > { %s268_s5 = sand.u32 1, %s563_s9   ;;  %p774_p3 = scmp.ge.s32.totalorder %s583_s14, 2 }
  0x58   : > { %s269_s16 = scalar_lea.sflag [#allocation4], %s268_s5 }
  0x59   : > { %p390_p13 = pnand %p774_p3, %p661_p11 }
  0x5b   : > { %p391_p5 = pneg %p390_p13 }
  0x5d   : > { %558 = dma.done.wait (%p391_p5), %s269_s16, 16  }
  0x5e   : > { %560 = vsyncadd (%p391_p5), %s269_s16, 4294967280  ;;  %s21_s14 = sadd.s32 1, %s583_s14   ;;  %s775_s9 = smov %s567_s10 }
  0x5f   : > { %p18_p12 = scmp.ge.s32.totalorder %s21_s14, 4   ;;  %s776_s10 = smov %s571_s11 }
  0x60   : > { %s777_s11 = smov %s659_s23  ;;  %s778_s12 = smov %s579_s13 }
  0x61   : > { %s779_s13 = smov %s781_s17  ;;  %20 = sbr.rel (!%p18_p12) target bundleno = 8 (0x8), region = 86 }
  0x66   :  { %273 = vsyncpa [#allocation3], 1 }
  0x67   :  { %275 = vsyncpa [#allocation3 + $0x1], 1 }
  0x68   :  { %276 = vsyncpa [#allocation6], 1 }
  0x69   :  { %278 = vsyncpa [#allocation6 + $0x1], 1 }
  0x6a   :  { %279 = vsyncpa [#allocation4], 1 }
  0x6b   :  { %281 = vsyncpa [#allocation4 + $0x1], 1 }

</bundles_post_ra>
